<compile_context>
chip_gen: v6e
topology: v6e:2x2x1
jax: 0.10.0
libtpu: 0.0.40
codegen_flags: <defaults>
</compile_context>

<pallas_src>
import math
import jax
import jax.numpy as jnp
from jax.experimental import pallas as pl
from jax.experimental.pallas import tpu as pltpu

LN_EPS = 1e-5


def _layernorm_mxu(x, ones_mat, inv_d, gamma, beta):
    """LayerNorm with row reductions done on the MXU (no XLU lane reductions).

    x:        (rows, D) float32
    ones_mat: (D, D)    bfloat16, all ones (exact)
    inv_d:    python float 1/D (applied in f32 on the VPU, exact for any D)
    """
    # Row sum via MXU, hi/lo split keeps ~f32 accuracy with bf16 MXU inputs.
    x_hi = x.astype(jnp.bfloat16)
    x_lo = (x - x_hi.astype(jnp.float32)).astype(jnp.bfloat16)
    row_sum = (jnp.dot(x_hi, ones_mat, preferred_element_type=jnp.float32)
               + jnp.dot(x_lo, ones_mat, preferred_element_type=jnp.float32))
    mean = row_sum * inv_d                      # already broadcast across lanes
    xc = x - mean
    # Two-pass (torch-style) biased variance of the centered values; bf16
    # rounding of xc^2 is ~0.2% relative, accumulated in f32 on the MXU.
    var = jnp.dot((xc * xc).astype(jnp.bfloat16), ones_mat,
                  preferred_element_type=jnp.float32) * inv_d
    inv = jax.lax.rsqrt(var + LN_EPS)
    return xc * inv * gamma + beta


def residual_layer_kernel(x_ref, ones_ref, w1_ref, g1_ref, b1_ref,
                          w2_ref, g2_ref, b2_ref, o_ref):
    D = x_ref.shape[-1]
    inv_d = 1.0 / D
    x = x_ref[...].astype(jnp.float32)                     # (tm, D)
    ones_mat = ones_ref[...]                               # (D, D) bf16

    # norm1 -> relu -> fc1   (dropout with rate 0.0 is identity, omitted)
    h = _layernorm_mxu(x, ones_mat, inv_d, g1_ref[...], b1_ref[...])
    h = jnp.maximum(h, 0.0)
    h = jnp.dot(h.astype(jnp.bfloat16), w1_ref[...],
                preferred_element_type=jnp.float32)

    # norm2 -> relu -> fc2
    h = _layernorm_mxu(h, ones_mat, inv_d, g2_ref[...], b2_ref[...])
    h = jnp.maximum(h, 0.0)
    h = jnp.dot(h.astype(jnp.bfloat16), w2_ref[...],
                preferred_element_type=jnp.float32)

    # Residual add re-reads x from the resident VMEM tile + final relu.
    out = jnp.maximum(h + x_ref[...].astype(jnp.float32), 0.0)
    o_ref[...] = out.astype(o_ref.dtype)


def residual_layer(x, w1, g1, b1, w2, g2, b2, *, tm=2048):
    """x: (..., D) float32. w1/w2: (D, D) laid out as [in, out]. g/b: (D,)."""
    orig_shape = x.shape
    D = orig_shape[-1]
    x2 = x.reshape(-1, D)
    N = x2.shape[0]

    # Row tile: multiple of 8 (sublane) and clamped so the grid has >=2 steps
    # (v7x megacore: dimension_semantics=("parallel",) shards grid over 2 TCs).
    half_rounded = ((pl.cdiv(N, 2) + 7) // 8) * 8
    tm_eff = max(8, (min(tm, half_rounded) // 8) * 8)
    grid_steps = pl.cdiv(N, tm_eff)   # ragged last block: no wrapper-side pad

    # MXU path in bf16 (f32 acc); halves weight DMA + VMEM.  LN params f32.
    w1b = w1.astype(jnp.bfloat16)
    w2b = w2.astype(jnp.bfloat16)
    g1 = g1.reshape(1, D).astype(jnp.float32)
    b1 = b1.reshape(1, D).astype(jnp.float32)
    g2 = g2.reshape(1, D).astype(jnp.float32)
    b2 = b2.reshape(1, D).astype(jnp.float32)
    ones_mat = jnp.ones((D, D), jnp.bfloat16)   # exact; used for MXU row sums

    row_spec = pl.BlockSpec((tm_eff, D), lambda i: (i, 0))
    w_spec = pl.BlockSpec((D, D), lambda i: (0, 0))
    v_spec = pl.BlockSpec((1, D), lambda i: (0, 0))

    # VMEM budget estimate (pipeline buffers); 4x headroom for in-kernel f32
    # temporaries, capped generation-aware (~0.55x physical VMEM per core).
    vmem_est = (2 * 2 * tm_eff * D * 4          # x + out tiles, 2 buffers, f32
                + 3 * 2 * D * D * 2             # w1 + w2 + ones, 2 buffers, bf16
                + 4 * 2 * D * 4)                # gamma/beta x2, 2 buffers, f32
    try:
        vmem_cap = int(getattr(pltpu.get_tpu_info(), "vmem_capacity_bytes",
                               64 * 2**20))
    except Exception:
        vmem_cap = 64 * 2**20                   # conservative (v7x per-TC)
    vmem_limit = int(min(max(4 * vmem_est, 32 * 2**20), (11 * vmem_cap) // 20))

    n_total = grid_steps * tm_eff
    cost = pl.CostEstimate(
        # 2 fc matmuls + 6 LN-reduction matmuls, all (n,D)x(D,D)
        flops=8 * 2 * n_total * D * D,
        transcendentals=2 * n_total,            # two rsqrt per row
        bytes_accessed=2 * N * D * 4 + 3 * D * D * 2 + 4 * D * 4,
    )

    out = pl.pallas_call(
        residual_layer_kernel,
        out_shape=jax.ShapeDtypeStruct((N, D), x.dtype),
        grid_spec=pltpu.PrefetchScalarGridSpec(
            num_scalar_prefetch=0,
            grid=(grid_steps,),
            in_specs=[row_spec, w_spec, w_spec, v_spec, v_spec,
                      w_spec, v_spec, v_spec],
            out_specs=row_spec,
        ),
        compiler_params=pltpu.CompilerParams(
            dimension_semantics=("parallel",),   # v7x: shard grid over 2 TCs
            vmem_limit_bytes=vmem_limit,
        ),
        cost_estimate=cost,
    )(x2, ones_mat, w1b, g1, b1, w2b, g2, b2)

    return out.reshape(orig_shape)


def init_linear_weight(key, width):
    # weight_initializer: fan_avg = width, std = sqrt(1 / fan_avg / 10),
    # truncated normal on [-2*std, 2*std].
    std = math.sqrt(1.0 / width / 10.0)
    w = jax.random.truncated_normal(key, -2.0, 2.0, (width, width),
                                    dtype=jnp.float32) * std
    # PyTorch weight is (out, in) and applies x @ W.T; we return W.T = (in, out).
    return w.T


def reference_kernel_math(x, w1, g1, b1, w2, g2, b2):
    """Pure-JAX mirror of the kernel math (bf16 MXU inputs, f32 acc)."""
    D = x.shape[-1]
    ones_mat = jnp.ones((D, D), jnp.bfloat16)
    inv_d = 1.0 / D
    h = jnp.maximum(_layernorm_mxu(x, ones_mat, inv_d, g1, b1), 0.0)
    h = jnp.dot(h.astype(jnp.bfloat16), w1.astype(jnp.bfloat16),
                preferred_element_type=jnp.float32)
    h = jnp.maximum(_layernorm_mxu(h, ones_mat, inv_d, g2, b2), 0.0)
    h = jnp.dot(h.astype(jnp.bfloat16), w2.astype(jnp.bfloat16),
                preferred_element_type=jnp.float32)
    return jnp.maximum(h + x, 0.0)


def reference_f32(x, w1, g1, b1, w2, g2, b2):
    """PyTorch-equivalent math in full f32 (two-pass LN variance)."""
    def ln(v, g, b):
        m = jnp.mean(v, axis=-1, keepdims=True)
        var = jnp.mean((v - m) * (v - m), axis=-1, keepdims=True)
        return (v - m) * jax.lax.rsqrt(var + LN_EPS) * g + b

    h = jnp.maximum(ln(x, g1, b1), 0.0)
    h = jnp.dot(h, w1, precision=jax.lax.Precision.HIGHEST)
    h = jnp.maximum(ln(h, g2, b2), 0.0)
    h = jnp.dot(h, w2, precision=jax.lax.Precision.HIGHEST)
    return jnp.maximum(h + x, 0.0)


if __name__ == "__main__":
    width = 128      # D (lane-dense)
    batch = 2
    seq = 8

    key = jax.random.PRNGKey(0)
    kx, k1, k2 = jax.random.split(key, 3)

    x = jax.random.normal(kx, (batch, seq, width), dtype=jnp.float32)
    w1 = init_linear_weight(k1, width)
    w2 = init_linear_weight(k2, width)
    # LayerNorm default init: gamma = 1, beta = 0
    g1 = jnp.ones((width,), jnp.float32)
    b1 = jnp.zeros((width,), jnp.float32)
    g2 = jnp.ones((width,), jnp.float32)
    b2 = jnp.zeros((width,), jnp.float32)

    out = residual_layer(x, w1, g1, b1, w2, g2, b2)
    out = jax.block_until_ready(out)
    assert out.shape == x.shape

    # Tight check against a reference that mirrors the kernel math exactly.
    ref_mx = reference_kernel_math(x, w1, g1, b1, w2, g2, b2)
    assert jnp.allclose(out, ref_mx, atol=2e-3, rtol=2e-3), \
        "mismatch vs kernel-math reference"

    # Loose semantic check against the pure-f32 PyTorch-equivalent math
    # (bf16 MXU inputs shift numerics slightly).
    ref_f32 = reference_f32(x, w1, g1, b1, w2, g2, b2)
    assert jnp.allclose(out, ref_f32, atol=5e-2, rtol=5e-2), \
        "mismatch vs f32 reference"

    print("KERNEL_OK")
</pallas_src>

<mosaic_0001>
module attributes {stable_mosaic.version = 11 : i64} {
  func.func @residual_layer_kernel(%arg0: i32, %arg1: memref<8x128xf32, #tpu.memory_space<vmem>>, %arg2: memref<128x128xbf16, #tpu.memory_space<vmem>>, %arg3: memref<128x128xbf16, #tpu.memory_space<vmem>>, %arg4: memref<1x128xf32, #tpu.memory_space<vmem>>, %arg5: memref<1x128xf32, #tpu.memory_space<vmem>>, %arg6: memref<128x128xbf16, #tpu.memory_space<vmem>>, %arg7: memref<1x128xf32, #tpu.memory_space<vmem>>, %arg8: memref<1x128xf32, #tpu.memory_space<vmem>>, %arg9: memref<8x128xf32, #tpu.memory_space<vmem>>) attributes {dimension_semantics = [#tpu.dimension_semantics<parallel>], iteration_bounds = array<i64: 2>, scalar_prefetch = 0 : i64, scratch_operands = 0 : i64, tpu.core_type = #tpu.core_type<tc>, window_params = [{transform_indices = @transform_0, window_bounds = array<i64: 8, 128>}, {pipeline_mode = #tpu.pipeline_mode<synchronous>, transform_indices = @transform_1, window_bounds = array<i64: 128, 128>}, {pipeline_mode = #tpu.pipeline_mode<synchronous>, transform_indices = @transform_2, window_bounds = array<i64: 128, 128>}, {pipeline_mode = #tpu.pipeline_mode<synchronous>, transform_indices = @transform_3, window_bounds = array<i64: 1, 128>}, {pipeline_mode = #tpu.pipeline_mode<synchronous>, transform_indices = @transform_4, window_bounds = array<i64: 1, 128>}, {pipeline_mode = #tpu.pipeline_mode<synchronous>, transform_indices = @transform_5, window_bounds = array<i64: 128, 128>}, {pipeline_mode = #tpu.pipeline_mode<synchronous>, transform_indices = @transform_6, window_bounds = array<i64: 1, 128>}, {pipeline_mode = #tpu.pipeline_mode<synchronous>, transform_indices = @transform_7, window_bounds = array<i64: 1, 128>}, {transform_indices = @transform_8, window_bounds = array<i64: 8, 128>}]} {
    %c0 = arith.constant 0 : index
    %c0_0 = arith.constant 0 : index
    %0 = vector.load %arg1[%c0, %c0_0] : memref<8x128xf32, #tpu.memory_space<vmem>>, vector<8x128xf32>
    %c0_1 = arith.constant 0 : index
    %c0_2 = arith.constant 0 : index
    %1 = vector.load %arg2[%c0_1, %c0_2] : memref<128x128xbf16, #tpu.memory_space<vmem>>, vector<128x128xbf16>
    %c0_3 = arith.constant 0 : index
    %c0_4 = arith.constant 0 : index
    %2 = vector.load %arg4[%c0_3, %c0_4] : memref<1x128xf32, #tpu.memory_space<vmem>>, vector<1x128xf32>
    %c0_5 = arith.constant 0 : index
    %c0_6 = arith.constant 0 : index
    %3 = vector.load %arg5[%c0_5, %c0_6] : memref<1x128xf32, #tpu.memory_space<vmem>>, vector<1x128xf32>
    %4 = arith.truncf %0 : vector<8x128xf32> to vector<8x128xbf16>
    %5 = arith.extf %4 : vector<8x128xbf16> to vector<8x128xf32>
    %6 = arith.subf %0, %5 : vector<8x128xf32>
    %7 = arith.truncf %6 : vector<8x128xf32> to vector<8x128xbf16>
    %cst = arith.constant dense<0.000000e+00> : vector<8x128xf32>
    %8 = tpu.matmul %4, %1, %cst {dimension_numbers = #tpu.dot_dimension_numbers<[1], [0], [0], [1], [0, 0, 1, 1], [], []>} : vector<8x128xbf16>, vector<128x128xbf16>, vector<8x128xf32> -> vector<8x128xf32>
    %cst_7 = arith.constant dense<0.000000e+00> : vector<8x128xf32>
    %9 = tpu.matmul %7, %1, %cst_7 {dimension_numbers = #tpu.dot_dimension_numbers<[1], [0], [0], [1], [0, 0, 1, 1], [], []>} : vector<8x128xbf16>, vector<128x128xbf16>, vector<8x128xf32> -> vector<8x128xf32>
    %10 = arith.addf %8, %9 : vector<8x128xf32>
    %cst_8 = arith.constant 7.812500e-03 : f32
    %11 = vector.broadcast %cst_8 : f32 to vector<8x128xf32>
    %12 = arith.mulf %10, %11 : vector<8x128xf32>
    %13 = arith.subf %0, %12 : vector<8x128xf32>
    %14 = arith.mulf %13, %13 : vector<8x128xf32>
    %15 = arith.truncf %14 : vector<8x128xf32> to vector<8x128xbf16>
    %cst_9 = arith.constant dense<0.000000e+00> : vector<8x128xf32>
    %16 = tpu.matmul %15, %1, %cst_9 {dimension_numbers = #tpu.dot_dimension_numbers<[1], [0], [0], [1], [0, 0, 1, 1], [], []>} : vector<8x128xbf16>, vector<128x128xbf16>, vector<8x128xf32> -> vector<8x128xf32>
    %cst_10 = arith.constant 7.812500e-03 : f32
    %17 = vector.broadcast %cst_10 : f32 to vector<8x128xf32>
    %18 = arith.mulf %16, %17 : vector<8x128xf32>
    %cst_11 = arith.constant 9.99999974E-6 : f32
    %19 = vector.broadcast %cst_11 : f32 to vector<8x128xf32>
    %20 = arith.addf %18, %19 : vector<8x128xf32>
    %21 = math.rsqrt %20 : vector<8x128xf32>
    %22 = arith.mulf %13, %21 : vector<8x128xf32>
    %23 = vector.broadcast %2 : vector<1x128xf32> to vector<8x128xf32>
    %24 = arith.mulf %22, %23 : vector<8x128xf32>
    %25 = vector.broadcast %3 : vector<1x128xf32> to vector<8x128xf32>
    %26 = arith.addf %24, %25 : vector<8x128xf32>
    %cst_12 = arith.constant 0.000000e+00 : f32
    %27 = vector.broadcast %cst_12 : f32 to vector<8x128xf32>
    %28 = arith.maximumf %26, %27 : vector<8x128xf32>
    %29 = arith.truncf %28 : vector<8x128xf32> to vector<8x128xbf16>
    %c0_13 = arith.constant 0 : index
    %c0_14 = arith.constant 0 : index
    %30 = vector.load %arg3[%c0_13, %c0_14] : memref<128x128xbf16, #tpu.memory_space<vmem>>, vector<128x128xbf16>
    %cst_15 = arith.constant dense<0.000000e+00> : vector<8x128xf32>
    %31 = tpu.matmul %29, %30, %cst_15 {dimension_numbers = #tpu.dot_dimension_numbers<[1], [0], [0], [1], [0, 0, 1, 1], [], []>} : vector<8x128xbf16>, vector<128x128xbf16>, vector<8x128xf32> -> vector<8x128xf32>
    %c0_16 = arith.constant 0 : index
    %c0_17 = arith.constant 0 : index
    %32 = vector.load %arg7[%c0_16, %c0_17] : memref<1x128xf32, #tpu.memory_space<vmem>>, vector<1x128xf32>
    %c0_18 = arith.constant 0 : index
    %c0_19 = arith.constant 0 : index
    %33 = vector.load %arg8[%c0_18, %c0_19] : memref<1x128xf32, #tpu.memory_space<vmem>>, vector<1x128xf32>
    %34 = arith.truncf %31 : vector<8x128xf32> to vector<8x128xbf16>
    %35 = arith.extf %34 : vector<8x128xbf16> to vector<8x128xf32>
    %36 = arith.subf %31, %35 : vector<8x128xf32>
    %37 = arith.truncf %36 : vector<8x128xf32> to vector<8x128xbf16>
    %cst_20 = arith.constant dense<0.000000e+00> : vector<8x128xf32>
    %38 = tpu.matmul %34, %1, %cst_20 {dimension_numbers = #tpu.dot_dimension_numbers<[1], [0], [0], [1], [0, 0, 1, 1], [], []>} : vector<8x128xbf16>, vector<128x128xbf16>, vector<8x128xf32> -> vector<8x128xf32>
    %cst_21 = arith.constant dense<0.000000e+00> : vector<8x128xf32>
    %39 = tpu.matmul %37, %1, %cst_21 {dimension_numbers = #tpu.dot_dimension_numbers<[1], [0], [0], [1], [0, 0, 1, 1], [], []>} : vector<8x128xbf16>, vector<128x128xbf16>, vector<8x128xf32> -> vector<8x128xf32>
    %40 = arith.addf %38, %39 : vector<8x128xf32>
    %cst_22 = arith.constant 7.812500e-03 : f32
    %41 = vector.broadcast %cst_22 : f32 to vector<8x128xf32>
    %42 = arith.mulf %40, %41 : vector<8x128xf32>
    %43 = arith.subf %31, %42 : vector<8x128xf32>
    %44 = arith.mulf %43, %43 : vector<8x128xf32>
    %45 = arith.truncf %44 : vector<8x128xf32> to vector<8x128xbf16>
    %cst_23 = arith.constant dense<0.000000e+00> : vector<8x128xf32>
    %46 = tpu.matmul %45, %1, %cst_23 {dimension_numbers = #tpu.dot_dimension_numbers<[1], [0], [0], [1], [0, 0, 1, 1], [], []>} : vector<8x128xbf16>, vector<128x128xbf16>, vector<8x128xf32> -> vector<8x128xf32>
    %cst_24 = arith.constant 7.812500e-03 : f32
    %47 = vector.broadcast %cst_24 : f32 to vector<8x128xf32>
    %48 = arith.mulf %46, %47 : vector<8x128xf32>
    %cst_25 = arith.constant 9.99999974E-6 : f32
    %49 = vector.broadcast %cst_25 : f32 to vector<8x128xf32>
    %50 = arith.addf %48, %49 : vector<8x128xf32>
    %51 = math.rsqrt %50 : vector<8x128xf32>
    %52 = arith.mulf %43, %51 : vector<8x128xf32>
    %53 = vector.broadcast %32 : vector<1x128xf32> to vector<8x128xf32>
    %54 = arith.mulf %52, %53 : vector<8x128xf32>
    %55 = vector.broadcast %33 : vector<1x128xf32> to vector<8x128xf32>
    %56 = arith.addf %54, %55 : vector<8x128xf32>
    %cst_26 = arith.constant 0.000000e+00 : f32
    %57 = vector.broadcast %cst_26 : f32 to vector<8x128xf32>
    %58 = arith.maximumf %56, %57 : vector<8x128xf32>
    %59 = arith.truncf %58 : vector<8x128xf32> to vector<8x128xbf16>
    %c0_27 = arith.constant 0 : index
    %c0_28 = arith.constant 0 : index
    %60 = vector.load %arg6[%c0_27, %c0_28] : memref<128x128xbf16, #tpu.memory_space<vmem>>, vector<128x128xbf16>
    %cst_29 = arith.constant dense<0.000000e+00> : vector<8x128xf32>
    %61 = tpu.matmul %59, %60, %cst_29 {dimension_numbers = #tpu.dot_dimension_numbers<[1], [0], [0], [1], [0, 0, 1, 1], [], []>} : vector<8x128xbf16>, vector<128x128xbf16>, vector<8x128xf32> -> vector<8x128xf32>
    %c0_30 = arith.constant 0 : index
    %c0_31 = arith.constant 0 : index
    %62 = vector.load %arg1[%c0_30, %c0_31] : memref<8x128xf32, #tpu.memory_space<vmem>>, vector<8x128xf32>
    %63 = arith.addf %61, %62 : vector<8x128xf32>
    %cst_32 = arith.constant 0.000000e+00 : f32
    %64 = vector.broadcast %cst_32 : f32 to vector<8x128xf32>
    %65 = arith.maximumf %63, %64 : vector<8x128xf32>
    %c0_33 = arith.constant 0 : index
    %c0_34 = arith.constant 0 : index
    %66 = vector.load %arg9[%c0_33, %c0_34] : memref<8x128xf32, #tpu.memory_space<vmem>>, vector<8x128xf32>
    tpu.vector_store %arg9[%c0_33, %c0_34], %65 {strides = array<i32>} : memref<8x128xf32, #tpu.memory_space<vmem>>, vector<8x128xf32>,
    return
  }
  func.func @transform_0(%arg0: i32) -> (i32, i32) {
    %c0_i32 = arith.constant 0 : i32
    %c0_i32_0 = arith.constant 0 : i32
    return %arg0, %c0_i32 : i32, i32
  }
  func.func @transform_1(%arg0: i32) -> (i32, i32) {
    %c0_i32 = arith.constant 0 : i32
    %c0_i32_0 = arith.constant 0 : i32
    %c0_i32_1 = arith.constant 0 : i32
    return %c0_i32, %c0_i32_0 : i32, i32
  }
  func.func @transform_2(%arg0: i32) -> (i32, i32) {
    %c0_i32 = arith.constant 0 : i32
    %c0_i32_0 = arith.constant 0 : i32
    %c0_i32_1 = arith.constant 0 : i32
    return %c0_i32, %c0_i32_0 : i32, i32
  }
  func.func @transform_3(%arg0: i32) -> (i32, i32) {
    %c0_i32 = arith.constant 0 : i32
    %c0_i32_0 = arith.constant 0 : i32
    %c0_i32_1 = arith.constant 0 : i32
    return %c0_i32, %c0_i32_0 : i32, i32
  }
  func.func @transform_4(%arg0: i32) -> (i32, i32) {
    %c0_i32 = arith.constant 0 : i32
    %c0_i32_0 = arith.constant 0 : i32
    %c0_i32_1 = arith.constant 0 : i32
    return %c0_i32, %c0_i32_0 : i32, i32
  }
  func.func @transform_5(%arg0: i32) -> (i32, i32) {
    %c0_i32 = arith.constant 0 : i32
    %c0_i32_0 = arith.constant 0 : i32
    %c0_i32_1 = arith.constant 0 : i32
    return %c0_i32, %c0_i32_0 : i32, i32
  }
  func.func @transform_6(%arg0: i32) -> (i32, i32) {
    %c0_i32 = arith.constant 0 : i32
    %c0_i32_0 = arith.constant 0 : i32
    %c0_i32_1 = arith.constant 0 : i32
    return %c0_i32, %c0_i32_0 : i32, i32
  }
  func.func @transform_7(%arg0: i32) -> (i32, i32) {
    %c0_i32 = arith.constant 0 : i32
    %c0_i32_0 = arith.constant 0 : i32
    %c0_i32_1 = arith.constant 0 : i32
    return %c0_i32, %c0_i32_0 : i32, i32
  }
  func.func @transform_8(%arg0: i32) -> (i32, i32) {
    %c0_i32 = arith.constant 0 : i32
    %c0_i32_0 = arith.constant 0 : i32
    return %arg0, %c0_i32 : i32, i32
  }
}

</mosaic_0001>

<bundles_post_ra>
// kernel: tpu_custom_call.1
= control target key start
LH: loop header
LB: loop body
LE: loop exit
PB: predicated region body
PF: predicated region fallthrough
CT: control target
= control target key end

     0   :  { %s2031_s0 = inlined_call_operand.hbm [shape: f32[16,128], index: 0, kind: input, shape index: {}]   ;;  %s2032_s1 = inlined_call_operand.hbm [shape: bf16[128,128], index: 1, kind: input, shape index: {}]   ;;  %s2033_s2 = inlined_call_operand.hbm [shape: bf16[128,128], index: 2, kind: input, shape index: {}]   ;;  %s2034_s3 = inlined_call_operand.vmem [shape: f32[1,128], index: 3, kind: input, shape index: {}]   ;;  %s2035_s4 = inlined_call_operand.vmem [shape: f32[1,128], index: 4, kind: input, shape index: {}]   ;;  %s2036_s5 = inlined_call_operand.hbm [shape: bf16[128,128], index: 5, kind: input, shape index: {}]   ;;  %s2037_s6 = inlined_call_operand.vmem [shape: f32[1,128], index: 6, kind: input, shape index: {}]   ;;  %s2038_s7 = inlined_call_operand.vmem [shape: f32[1,128], index: 7, kind: input, shape index: {}]   ;;  %s2039_s8 = inlined_call_operand.hbm [shape: f32[16,128], index: 8, kind: output, shape index: {}]  }
   0x1   :  { %2044 = sst [smem:[#allocation15_spill]] %s2032_s1 }
   0x2   :  { %2045 = sst [smem:[#allocation16_spill]] %s2033_s2 }
   0x3   :  { %2046 = sst [smem:[#allocation17_spill]] %s2036_s5 }
   0x4   :  { %13 = vsyncpa [#allocation3], 0 }
   0x5   :  { %15 = vsyncpa [#allocation3 + $0x1], 0 }
   0x6   :  { %16 = vsyncpa [#allocation6], 0 }
   0x7   :  { %17 = vsyncpa [#allocation9], 0 }
   0x8   :  { %18 = vsyncpa [#allocation4], 0 }
   0x9   :  { %20 = vsyncpa [#allocation4 + $0x1], 0  ;;  %s1675_s27 = smov 0   ;;  %s1677_s28 = smov 0  }
   0xa   :  { %s1679_s29 = smov 0   ;;  %s1681_s30 = smov 0  }
   0xb LB: > { %s1696_s9 = sadd.s32 4294967295, %s1619_s30   ;;  %s1054_s10 = sadd.s32 4294967294, %s1619_s30   ;;  %s1619_s30 = sphi %s1681_s30, %s2069_s30   ;;  %s1615_s29 = sphi %s1679_s29, %s2068_s29   ;;  %s1611_s28 = sphi %s1677_s28, %s2067_s28   ;;  %s1607_s27 = sphi %s1675_s27, %s2066_s27  }
   0xc   : > { %p46_p0 = scmp.ne.s32.totalorder %s1611_s28, %s1607_s27  ;;  %p2040_p1 = scmp.eq.s32.totalorder %s1696_s9, 0 }
   0xd   : > { %p223_p3 = scmp.eq.s32.totalorder %s1054_s10, 1  ;;  %p1055_p5 = scmp.ge.s32.totalorder %s1619_s30, 1 }
   0xe   : > { %p1705_p4 = por %p2040_p1, %p46_p0  ;;  %p230_p7 = scmp.lt.s32.totalorder %s1619_s30, 3 }
   0xf   : > { %p1710_p6 = por %p223_p3, %p46_p0  ;;  %s1621_s14 = smov [#allocation5]  }
  0x10   : > { %s2047_s11 = scalar_select %p1705_p4, 1, 0 }
  0x11   : > { %s2048_s12 = scalar_select %p1710_p6, 1, 0 }
  0x12   : > { %p1715_p8 = pnand %p1055_p5, %p230_p7  ;;  %s242_s15 = sshll.u32 %s1621_s14, 4  ;;  %s243_s15 = int_to_ptr.vmem [resolvable:$true] %s242_s15 }
  0x13   : > { %s1622_s17 = smov [#allocation7]   ;;  %s1623_s19 = smov [#allocation8]  }
  0x14   : > { %s2049_s13 = scalar_select %p1715_p8, 1, 0 }
  0x15   : > { %p1348_p9 = pneg %p1715_p8  ;;  %s255_s18 = sshll.u32 %s1622_s17, 4  ;;  %s256_s18 = int_to_ptr.vmem [resolvable:$true] %s255_s18 }
  0x16   : > { %s274_s20 = sshll.u32 %s1623_s19, 4  ;;  %s1452_s21 = scalar_lea.vmem %s243_s15, 1024  ;;  %s275_s20 = int_to_ptr.vmem [resolvable:$true] %s274_s20 }
  0x17   : > { %p1724_p11 = pnand %p1348_p9, %p2040_p1  ;;  %p1453_p13 = scmp.ne.s32.totalorder %s243_s15, %s1452_s21 }
  0x18   : > { %p1460_p5 = scmp.lt.s32.totalorder %s243_s15, %s243_s15  ;;  %p1461_p7 = scmp.lt.s32.totalorder %s1452_s21, %s1452_s21 }
  0x19   : > { %p1443_p12 = pneg %p1724_p11 }
  0x1a   : > { %p1462_p9 = por %p1461_p7, %p1460_p5 }
  0x1b   : > { %p1455_p0 = pnand %p1453_p13, %p1443_p12 }
  0x1d   : > { %p1456_p3 = pneg %p1455_p0 }
  0x1f   : > { %p1463_p10 = pnand %p1462_p9, %p1456_p3 }
  0x21   : > { %1466 = shalt.err (!%p1463_p10)
}
  0x22   : > { %s1624_s22 = smov 64   ;;  %s1625_s23 = smov 4  }
  0x23   : > { %s2051_s1 = sld [smem:[#allocation15_spill]]  ;;  %s1478_s26 = scalar_lea.vmem %s256_s18, 1024 }
  0x24   : > { %p1479_p1 = scmp.ne.s32.totalorder %s256_s18, %s1478_s26  ;;  %p1486_p2 = scmp.lt.s32.totalorder %s256_s18, %s256_s18 }
  0x25   : > { %p1487_p6 = scmp.lt.s32.totalorder %s1478_s26, %s1478_s26 }
  0x26   : > { %p1481_p13 = pnand %p1479_p1, %p1443_p12 }
  0x27   : > { %p1488_p5 = por %p1487_p6, %p1486_p2 }
  0x28   : > { %p1482_p0 = pneg %p1481_p13 }
  0x29   : > { %1351 = dma.hbm_to_vmem [thread:$0]  (!%p1724_p11), %s2051_s1, 1024, %s243_s15, [#allocation6], %s1624_s22, %s1624_s22, %s1625_s23  }
  0x2a   : > { %p1489_p3 = pnand %p1488_p5, %p1482_p0 }
  0x2c   : > { %1492 = shalt.err (!%p1489_p3)
}
  0x2d   : > { %s2052_s2 = sld [smem:[#allocation16_spill]]  ;;  %s1504_s15 = scalar_lea.vmem %s275_s20, 1024 }
  0x2e   : > { %p1505_p10 = scmp.ne.s32.totalorder %s275_s20, %s1504_s15  ;;  %p1512_p9 = scmp.lt.s32.totalorder %s275_s20, %s275_s20 }
  0x2f   : > { %p1513_p13 = scmp.lt.s32.totalorder %s1504_s15, %s1504_s15 }
  0x30   : > { %p1507_p7 = pnand %p1505_p10, %p1443_p12 }
  0x31   : > { %p1514_p4 = por %p1513_p13, %p1512_p9 }
  0x32   : > { %p1508_p1 = pneg %p1507_p7 }
  0x33   : > { %1354 = dma.hbm_to_vmem [thread:$0]  (!%p1724_p11), %s2052_s2, 1024, %s256_s18, [#allocation6], %s1624_s22, %s1624_s22, %s1625_s23  }
  0x34   : > { %p1515_p2 = pnand %p1514_p4, %p1508_p1 }
  0x36   : > { %1518 = shalt.err (!%p1515_p2)
}
  0x37   : > { %s2053_s5 = sld [smem:[#allocation17_spill]]  ;;  %s1755_s18 = sadd.s32 1, %s1619_s30  }
  0x38   : > { %s30_s21 = ssub.s32 %s1619_s30, %s1755_s18  ;;  %s33_s16 = sadd.s32 1, %s1615_s29 }
  0x39   : > { %p31_p4 = scmp.eq.s32.totalorder %s30_s21, 0  ;;  %p40_p6 = scmp.ne.s32.totalorder %s1615_s29, %s1611_s28 }
  0x3a   : > { %p41_p12 = scmp.eq.s32.totalorder %s1619_s30, 0  ;;  %p1369_p0 = scmp.lt.s32.totalorder %s1619_s30, 2 }
  0x3b   : > { %s1765_s24 = scalar_select %p31_p4, %s1615_s29, %s33_s16  }
  0x3c   : > { %p42_p5 = por %p41_p12, %p40_p6  ;;  %p2054_p3 = scmp.eq.s32.totalorder %s1696_s9, 1 }
  0x3d   : > { %1357 = dma.hbm_to_vmem [thread:$0]  (!%p1724_p11), %s2053_s5, 1024, %s275_s20, [#allocation9], %s1624_s22, %s1624_s22, %s1625_s23  }
  0x3e   : > { %p1769_p10 = por %p2054_p3, %p40_p6  ;;  %s294_s26 = sand.u32 1, %s1615_s29  }
  0x3f   : > { %s1061_s10 = sshll.u32 %s1619_s30, 7  ;;  %s1060_s20 = sshll.u32 %s294_s26, 3 }
  0x40   : > { %s2055_s25 = scalar_select %p1769_p10, 1, 0 }
  0x41   : > { %s1778_s14 = scalar_lea.hbm %s2031_s0, %s1061_s10  ;;  %s298_s15 = scalar_lea.vmem [#allocation2], %s1060_s20 }
  0x42   : > { %s305_s17 = sshll.u32 %s298_s15, 4  ;;  %p1780_p11 = pnand %p1369_p0, %p42_p5  ;;  %s306_s17 = int_to_ptr.vmem [resolvable:$true] %s305_s17 }
  0x43   : > { %s295_s21 = scalar_lea.sflag [#allocation3], %s294_s26  ;;  %s1519_s16 = scalar_lea.hbm %s1778_s14, 128 }
  0x44   : > { %p1520_p7 = scmp.ne.s32.totalorder %s1778_s14, %s1519_s16  ;;  %p1521_p1 = pneg %p1780_p11 }
  0x45   : > { %s1524_s23 = scalar_lea.hbm %s2031_s0, 256  ;;  %p1525_p2 = scmp.lt.s32.totalorder %s1778_s14, %s2031_s0 }
  0x46   : > { %p1522_p9 = pnand %p1521_p1, %p1520_p7  ;;  %p1526_p4 = scmp.lt.s32.totalorder %s1524_s23, %s1519_s16 }
  0x48   : > { %p1523_p13 = pneg %p1522_p9  ;;  %p1527_p6 = por %p1526_p4, %p1525_p2 }
  0x4a   : > { %p1528_p12 = pnand %p1527_p6, %p1523_p13 }
  0x4c   : > { %1531 = shalt.err (!%p1528_p12)
}
  0x4d   : > { %s1532_s15 = scalar_lea.vmem %s306_s17, 128  ;;  %s1626_s26 = smov [#allocation2]  }
  0x4e   : > { %p1533_p0 = scmp.ne.s32.totalorder %s306_s17, %s1532_s15  ;;  %s1537_s2 = sshll.u32 %s1626_s26, 4  ;;  %s1538_s2 = int_to_ptr.vmem [resolvable:$false] %s1537_s2 }
  0x4f   : > { %s1539_s5 = scalar_lea.vmem %s1538_s2, 256  ;;  %p1540_p7 = scmp.lt.s32.totalorder %s306_s17, %s1538_s2 }
  0x50   : > { %p1535_p5 = pnand %p1533_p0, %p1521_p1  ;;  %p1541_p9 = scmp.lt.s32.totalorder %s1539_s5, %s1532_s15 }
  0x52   : > { %p1536_p3 = pneg %p1535_p5  ;;  %p1542_p10 = por %p1541_p9, %p1540_p7 }
  0x54   : > { %p1543_p8 = pnand %p1542_p10, %p1536_p3 }
  0x56   : > { %1546 = shalt.err (!%p1543_p8)
}
  0x57   : > { %1361 = dma.hbm_to_vmem [thread:$0]  (!%p1780_p11), %s1778_s14, 128, %s306_s17, %s295_s21  }
  0x58   : > { %p2057_p13 = scmp.ne.s32.totalorder %s2049_s13, 0 }
  0x59   : > { %s1801_s1 = sand.u32 (!%p2057_p13), 1, %s1611_s28   ;;  %p2058_p10 = scmp.ne.s32.totalorder (!%p2057_p13), %s2047_s11, 0 }
  0x5a   : > { %314 = sbr.rel (%p2057_p13) target bundleno = 1396 (0x574), region = 52  ;;  %s1063_s16 = sshll.u32 (!%p2057_p13), %s1801_s1, 3 }
  0x5b   : > { %s317_s2 = scalar_lea.sflag (!%p2057_p13), [#allocation3], %s1801_s1  ;;  %s320_s5 = scalar_lea.vmem (!%p2057_p13), [#allocation2], %s1063_s16 }
  0x5f   : > { %1590 = dma.done.wait (%p2058_p10), %s317_s2, 128  }
  0x60   : > { %1592 = vsyncadd (%p2058_p10), %s317_s2, 4294967168  ;;  %p2059_p8 = scmp.eq.s32.totalorder %s1696_s9, 0 }
  0x62   : > { %1594 = dma.done.wait (%p2059_p8), [#allocation6], 2048   ;;  %p2060_p11 = pmov %p2059_p8 }
  0x63   : > { %p2061_p1 = pmov %p2059_p8 }
  0x64   : > { %1596 = vsyncadd (%p2060_p11), [#allocation6], 4294965248 }
  0x65   : > { %1598 = dma.done.wait (%p2061_p1), [#allocation9], 1024   ;;  %p2062_p2 = pmov %p2061_p1 }
  0x66   : > { %v1627_v0 = vmov 0.0   ;;  %vm1628_vm0 = vmmov 0   ;;  %v1825_v1 = vld [vmem:[#allocation5 + $0x38] sm:$0xff]   ;;  %v1829_v2 = vld [vmem:[#allocation5 + $0x30] sm:$0xff]   ;;  %v1835_v3 = vld [vmem:[#allocation5 + $0x28] sm:$0xff]   ;;  %s1097_s23 = sshll.u32 %s1696_s9, 7 }
  0x67   : > { %1600 = vsyncadd (%p2062_p2), [#allocation9], 4294966272  ;;  %1172 = vmatprep.subr.bf16.mxu0 %v1627_v0  ;;  %1192 = vmatprep.subr.bf16.mxu1 %v1627_v0  ;;  %v1839_v4 = vld [vmem:[#allocation5 + $0x20] sm:$0xff]   ;;  %v1845_v5 = vld [vmem:[#allocation5 + $0x18] sm:$0xff]   ;;  %s364_s20 = scalar_lea.vmem [#allocation10], %s1063_s16  ;;  %s942_s9 = scalar_lea.sflag [#allocation4], %s1801_s1 }
  0x68   : > { %1188 = vmatprep.mubr.msk.bf16.mxu0 %vm1628_vm0, %v1627_v0  ;;  %1208 = vmatprep.mubr.msk.bf16.mxu1 %vm1628_vm0, %v1627_v0  ;;  %v1847_v6 = vld [vmem:[%s320_s5] sm:$0xff]  ;;  %v1863_v10 = vld [vmem:[#allocation5 + $0x8] sm:$0xff]   ;;  %v1870_v12 = vld [vmem:[#allocation5] sm:$0xff]   ;;  %s955_s15 = sshll.u32 %s364_s20, 4  ;;  %s1988_s5 = scalar_lea.hbm %s2039_s8, %s1097_s23  ;;  %s1990_s15 = int_to_ptr.vmem [resolvable:$true] %s955_s15 }
  0x69   : > { %1173 = vmatpush3.bf16.msra.mxu0 %v1825_v1  ;;  %1193 = vmatpush3.bf16.msra.mxu1 %v1825_v1  ;;  %v1853_v7 = vld [vmem:[#allocation5 + $0x10] sm:$0xff]   ;;  %v385_v8 = vpack.c.bf16 %v1847_v6, %v1847_v6  ;;  %v1421_v14 = vld [vmem:[#allocation7 + $0x38] sm:$0xff]   ;;  %v1423_v29 = vld [vmem:[#allocation7 + $0x28] sm:$0xff]   ;;  %s1547_s16 = scalar_lea.vmem %s1990_s15, 128  ;;  %p2063_p6 = scmp.ne.s32.totalorder %s2055_s25, 0 }
  0x6a   : > { %1174 = vmatprep.subr.bf16.mxu0 %v1627_v0  ;;  %1194 = vmatprep.subr.bf16.mxu1 %v1627_v0  ;;  %v1422_v28 = vld [vmem:[#allocation7 + $0x30] sm:$0xff]   ;;  %v1424_v30 = vld [vmem:[#allocation7 + $0x20] sm:$0xff]   ;;  %v1425_v31 = vld [vmem:[#allocation7 + $0x18] sm:$0xff]   ;;  %p1548_p4 = scmp.ne.s32.totalorder %s1990_s15, %s1547_s16  ;;  %s1629_s11 = smov [#allocation10]  }
  0x6b   : > { %v386_v9 = vunpack.c.l.bf16 %v385_v8  ;;  %v1426_v32 = vld [vmem:[#allocation7 + $0x10] sm:$0xff]   ;;  %v1427_v33 = vld [vmem:[#allocation7 + $0x8] sm:$0xff]   ;;  %v1428_v34 = vld [vmem:[#allocation7] sm:$0xff]   ;;  %s1551_s13 = sshll.u32 %s1629_s11, 4  ;;  %s1552_s13 = int_to_ptr.vmem [resolvable:$false] %s1551_s13 }
  0x6c   : > { %v1076_v42 = vld [vmem:[%s2034_s3] ss:$0 sm:$0xff]  ;;  %v1429_v57 = vld [vmem:[#allocation8 + $0x38] sm:$0xff]   ;;  %p1549_p12 = pnand %p1548_p4, %p2063_p6  ;;  %s1553_s14 = scalar_lea.vmem %s1552_s13, 256 }
  0x6d   : > { %1175 = vmatpush3.bf16.msra.mxu0 %v1829_v2  ;;  %1195 = vmatpush3.bf16.msra.mxu1 %v1829_v2  ;;  %v387_v11 = vsub.f32 %v1847_v6, %v386_v9  ;;  %v1077_v44 = vld [vmem:[%s2035_s4] ss:$0 sm:$0xff]  ;;  %p1554_p5 = scmp.lt.s32.totalorder %s1990_s15, %s1552_s13  ;;  %p1555_p3 = scmp.lt.s32.totalorder %s1553_s14, %s1547_s16 }
  0x6e   : > { %1176 = vmatprep.subr.bf16.mxu0 %v1627_v0  ;;  %1196 = vmatprep.subr.bf16.mxu1 %v1627_v0  ;;  %v1430_v9 = vld [vmem:[#allocation8 + $0x30] sm:$0xff]   ;;  %p1550_p0 = pneg %p1549_p12 }
  0x6f   : > { %v388_v13 = vpack.c.bf16 %v387_v11, %v387_v11  ;;  %v1432_v11 = vld [vmem:[#allocation8 + $0x20] sm:$0xff]   ;;  %p1556_p7 = por %p1555_p3, %p1554_p5 }
  0x71   : > { %1177 = vmatpush3.bf16.msra.mxu0 %v1835_v3  ;;  %1197 = vmatpush3.bf16.msra.mxu1 %v1835_v3  ;;  %p1557_p9 = pnand %p1556_p7, %p1550_p0 }
  0x72   : > { %1178 = vmatprep.subr.bf16.mxu0 %v1627_v0  ;;  %1198 = vmatprep.subr.bf16.mxu1 %v1627_v0 }
  0x75   : > { %1179 = vmatpush3.bf16.msra.mxu0 %v1839_v4  ;;  %1199 = vmatpush3.bf16.msra.mxu1 %v1839_v4 }
  0x76   : > { %1180 = vmatprep.subr.bf16.mxu0 %v1627_v0  ;;  %1200 = vmatprep.subr.bf16.mxu1 %v1627_v0 }
  0x79   : > { %1181 = vmatpush3.bf16.msra.mxu0 %v1845_v5  ;;  %1201 = vmatpush3.bf16.msra.mxu1 %v1845_v5 }
  0x7a   : > { %1182 = vmatprep.subr.bf16.mxu0 %v1627_v0  ;;  %1202 = vmatprep.subr.bf16.mxu1 %v1627_v0 }
  0x7d   : > { %1183 = vmatpush3.bf16.msra.mxu0 %v1853_v7  ;;  %1203 = vmatpush3.bf16.msra.mxu1 %v1853_v7 }
  0x7e   : > { %1184 = vmatprep.subr.bf16.mxu0 %v1627_v0  ;;  %1204 = vmatprep.subr.bf16.mxu1 %v1627_v0 }
  0x81   : > { %1185 = vmatpush3.bf16.msra.mxu0 %v1863_v10  ;;  %1205 = vmatpush3.bf16.msra.mxu1 %v1863_v10 }
  0x82   : > { %1186 = vmatprep.subr.bf16.mxu0 %v1627_v0  ;;  %1206 = vmatprep.subr.bf16.mxu1 %v1627_v0 }
  0x85   : > { %1187 = vmatpush3.bf16.msra.mxu0 %v1870_v12  ;;  %1207 = vmatpush3.bf16.msra.mxu1 %v1870_v12 }
  0x86   : > { %1212 = vmatprep.subr.bf16.mxu0 %v1627_v0  ;;  %1232 = vmatprep.subr.bf16.mxu1 %v1627_v0 }
  0x88   : > { %1189 = vmatmul.mubr.bf16.vlgmr.msra.gmra.mxu0 %v388_v13  ;;  %1209 = vmatmul.mubr.bf16.vlgmr.msra.gmra.mxu1 %v385_v8  ;;  %v1434_v13 = vld [vmem:[#allocation8 + $0x10] sm:$0xff]  }
  0x89   : > { %1213 = vmatpush3.bf16.msra.mxu0 %v1825_v1  ;;  %1228 = vmatprep.mubr.msk.bf16.mxu0 %vm1628_vm0, %v1627_v0 }
  0x8a   : > { %1214 = vmatprep.subr.bf16.mxu0 %v1627_v0  ;;  %1248 = vmatprep.mubr.msk.bf16.mxu1 %vm1628_vm0, %v1627_v0 }
  0x8b   : > { %1233 = vmatpush3.bf16.msra.mxu1 %v1421_v14  ;;  %v1435_v14 = vld [vmem:[#allocation8 + $0x8] sm:$0xff]  }
  0x8c   : > { %1234 = vmatprep.subr.bf16.mxu1 %v1627_v0 }
  0x8d   : > { %1215 = vmatpush3.bf16.msra.mxu0 %v1829_v2 }
  0x8e   : > { %1216 = vmatprep.subr.bf16.mxu0 %v1627_v0 }
  0x8f   : > { %1235 = vmatpush3.bf16.msra.mxu1 %v1422_v28 }
  0x90   : > { %1236 = vmatprep.subr.bf16.mxu1 %v1627_v0 }
  0x91   : > { %1217 = vmatpush3.bf16.msra.mxu0 %v1835_v3 }
  0x92   : > { %1218 = vmatprep.subr.bf16.mxu0 %v1627_v0 }
  0x93   : > { %1237 = vmatpush3.bf16.msra.mxu1 %v1423_v29 }
  0x94   : > { %1238 = vmatprep.subr.bf16.mxu1 %v1627_v0 }
  0x95   : > { %1219 = vmatpush3.bf16.msra.mxu0 %v1839_v4 }
  0x96   : > { %1220 = vmatprep.subr.bf16.mxu0 %v1627_v0 }
  0x97   : > { %1239 = vmatpush3.bf16.msra.mxu1 %v1424_v30 }
  0x98   : > { %1240 = vmatprep.subr.bf16.mxu1 %v1627_v0 }
  0x99   : > { %1221 = vmatpush3.bf16.msra.mxu0 %v1845_v5 }
  0x9a   : > { %1222 = vmatprep.subr.bf16.mxu0 %v1627_v0 }
  0x9b   : > { %1241 = vmatpush3.bf16.msra.mxu1 %v1425_v31 }
  0x9c   : > { %1242 = vmatprep.subr.bf16.mxu1 %v1627_v0 }
  0x9d   : > { %1223 = vmatpush3.bf16.msra.mxu0 %v1853_v7 }
  0x9e   : > { %1224 = vmatprep.subr.bf16.mxu0 %v1627_v0 }
  0x9f   : > { %1243 = vmatpush3.bf16.msra.mxu1 %v1426_v32 }
  0xa0   : > { %1244 = vmatprep.subr.bf16.mxu1 %v1627_v0 }
  0xa1   : > { %1225 = vmatpush3.bf16.msra.mxu0 %v1863_v10 }
  0xa2   : > { %1226 = vmatprep.subr.bf16.mxu0 %v1627_v0 }
  0xa3   : > { %1245 = vmatpush3.bf16.msra.mxu1 %v1427_v33 }
  0xa4   : > { %1246 = vmatprep.subr.bf16.mxu1 %v1627_v0 }
  0xa5   : > { %1227 = vmatpush3.bf16.msra.mxu0 %v1870_v12 }
  0xa6   : > { %1252 = vmatprep.subr.bf16.mxu0 %v1627_v0 }
  0xa7   : > { %1247 = vmatpush3.bf16.msra.mxu1 %v1428_v34 }
  0xa8   : > { %1272 = vmatprep.subr.bf16.mxu1 %v1627_v0 }
 0x148   : > { %v471_v15 = vpop.f32.mrf.mxu0  ;;  %v511_v16 = vpop.f32.mrf.mxu1 }
 0x149   : > { %v512_v17 = vadd.f32 %v511_v16, %v471_v15  ;;  %v1436_v15 = vld [vmem:[#allocation8] sm:$0xff]  }
 0x14a   : > { %v1190_v18 = vpop.f32.mrf.mxu0  ;;  %v1210_v19 = vpop.f32.mrf.mxu1 }
 0x14b   : > { %v517_v20 = vmul.f32 0.0078125, %v512_v17 }
 0x14c   : > { %v474_v21 = vpop.f32.mrf.mxu0  ;;  %v514_v22 = vpop.f32.mrf.mxu1 }
 0x14d   : > { %v518_v23 = vsub.f32 %v1847_v6, %v517_v20 }
 0x14e   : > { %v1191_v24 = vpop.f32.mrf.mxu0  ;;  %v1211_v25 = vpop.f32.mrf.mxu1 }
 0x14f   : > { %v519_v26 = vmul.f32 %v518_v23, %v518_v23 }
 0x151   : > { %v520_v27 = vpack.c.bf16 %v519_v26, %v519_v26 }
 0x153   : > { %1229 = vmatmul.mubr.bf16.vlgmr.msra.gmra.mxu0 %v520_v27 }
 0x154   : > { %1253 = vmatpush3.bf16.msra.mxu0 %v1825_v1  ;;  %1268 = vmatprep.mubr.msk.bf16.mxu0 %vm1628_vm0, %v1627_v0 }
 0x155   : > { %1254 = vmatprep.subr.bf16.mxu0 %v1627_v0 }
 0x158   : > { %1255 = vmatpush3.bf16.msra.mxu0 %v1829_v2 }
 0x159   : > { %1256 = vmatprep.subr.bf16.mxu0 %v1627_v0 }
 0x15c   : > { %1257 = vmatpush3.bf16.msra.mxu0 %v1835_v3 }
 0x15d   : > { %1258 = vmatprep.subr.bf16.mxu0 %v1627_v0 }
 0x160   : > { %1259 = vmatpush3.bf16.msra.mxu0 %v1839_v4 }
 0x161   : > { %1260 = vmatprep.subr.bf16.mxu0 %v1627_v0 }
 0x164   : > { %1261 = vmatpush3.bf16.msra.mxu0 %v1845_v5 }
 0x165   : > { %1262 = vmatprep.subr.bf16.mxu0 %v1627_v0 }
 0x168   : > { %1263 = vmatpush3.bf16.msra.mxu0 %v1853_v7 }
 0x169   : > { %1264 = vmatprep.subr.bf16.mxu0 %v1627_v0 }
 0x16c   : > { %1265 = vmatpush3.bf16.msra.mxu0 %v1863_v10 }
 0x16d   : > { %1266 = vmatprep.subr.bf16.mxu0 %v1627_v0 }
 0x170   : > { %1267 = vmatpush3.bf16.msra.mxu0 %v1870_v12 }
 0x171   : > { %1292 = vmatprep.subr.bf16.mxu0 %v1627_v0 }
 0x213   : > { %v555_v35 = vpop.f32.mrf.mxu0 }
 0x214   : > { %v561_v36 = vmul.f32 0.0078125, %v555_v35 }
 0x215   : > { %v1230_v37 = vpop.f32.mrf.mxu0 }
 0x216   : > { %v562_v38 = vadd.f32 1e-05, %v561_v36 }
 0x217   : > { %v558_v39 = vpop.f32.mrf.mxu0 }
 0x218   : > { %1437 = vrsqrt.f32 %v562_v38 }
 0x219   : > { %v1231_v40 = vpop.f32.mrf.mxu0 }
 0x225   : > { %v1438_v41 = vpop.eup %1437 }
 0x226   : > { %v564_v43 = vmul.f32 %v1438_v41, %v518_v23  ;;  %v1086_v23 = vld [vmem:[%s2037_s6] ss:$0 sm:$0xff] }
 0x228   : > { %v571_v45 = vmul.f32 %v1076_v42, %v564_v43 }
 0x22a   : > { %v578_v46 = vadd.f32 %v1077_v44, %v571_v45 }
 0x22c   : > { %v579_v47 = vmax.f32 %v578_v46, 0.0 }
 0x22e   : > { %v580_v48 = vpack.c.bf16 %v579_v47, %v579_v47 }
 0x230   : > { %1249 = vmatmul.mubr.bf16.vlgmr.msra.gmra.mxu1 %v580_v48 }
 0x231   : > { %1273 = vmatpush3.bf16.msra.mxu1 %v1825_v1  ;;  %1288 = vmatprep.mubr.msk.bf16.mxu1 %vm1628_vm0, %v1627_v0 }
 0x232   : > { %1274 = vmatprep.subr.bf16.mxu1 %v1627_v0 }
 0x235   : > { %1275 = vmatpush3.bf16.msra.mxu1 %v1829_v2 }
 0x236   : > { %1276 = vmatprep.subr.bf16.mxu1 %v1627_v0 }
 0x239   : > { %1277 = vmatpush3.bf16.msra.mxu1 %v1835_v3 }
 0x23a   : > { %1278 = vmatprep.subr.bf16.mxu1 %v1627_v0 }
 0x23d   : > { %1279 = vmatpush3.bf16.msra.mxu1 %v1839_v4 }
 0x23e   : > { %1280 = vmatprep.subr.bf16.mxu1 %v1627_v0 }
 0x241   : > { %1281 = vmatpush3.bf16.msra.mxu1 %v1845_v5 }
 0x242   : > { %1282 = vmatprep.subr.bf16.mxu1 %v1627_v0 }
 0x245   : > { %1283 = vmatpush3.bf16.msra.mxu1 %v1853_v7 }
 0x246   : > { %1284 = vmatprep.subr.bf16.mxu1 %v1627_v0 }
 0x249   : > { %1285 = vmatpush3.bf16.msra.mxu1 %v1863_v10 }
 0x24a   : > { %1286 = vmatprep.subr.bf16.mxu1 %v1627_v0 }
 0x24d   : > { %1287 = vmatpush3.bf16.msra.mxu1 %v1870_v12 }
 0x24e   : > { %1312 = vmatprep.subr.bf16.mxu1 %v1627_v0 }
 0x2f0   : > { %v679_v49 = vpop.f32.mrf.mxu1 }
 0x2f1   : > { %v687_v50 = vpack.c.bf16 %v679_v49, %v679_v49 }
 0x2f2   : > { %v1250_v51 = vpop.f32.mrf.mxu1 }
 0x2f3   : > { %v688_v52 = vunpack.c.l.bf16 %v687_v50  ;;  %1289 = vmatmul.mubr.bf16.vlgmr.msra.gmra.mxu1 %v687_v50 }
 0x2f4   : > { %v682_v53 = vpop.f32.mrf.mxu1  ;;  %1328 = vmatprep.mubr.msk.bf16.mxu1 %vm1628_vm0, %v1627_v0  ;;  %1313 = vmatpush3.bf16.msra.mxu1 %v1429_v57 }
 0x2f5   : > { %v689_v54 = vsub.f32 %v679_v49, %v688_v52  ;;  %1314 = vmatprep.subr.bf16.mxu1 %v1627_v0 }
 0x2f6   : > { %v1251_v55 = vpop.f32.mrf.mxu1 }
 0x2f7   : > { %v690_v56 = vpack.c.bf16 %v689_v54, %v689_v54 }
 0x2f8   : > { %1315 = vmatpush3.bf16.msra.mxu1 %v1430_v9 }
 0x2f9   : > { %1269 = vmatmul.mubr.bf16.vlgmr.msra.gmra.mxu0 %v690_v56  ;;  %1316 = vmatprep.subr.bf16.mxu1 %v1627_v0 }
 0x2fa   : > { %1293 = vmatpush3.bf16.msra.mxu0 %v1825_v1  ;;  %1308 = vmatprep.mubr.msk.bf16.mxu0 %vm1628_vm0, %v1627_v0 }
 0x2fb   : > { %1294 = vmatprep.subr.bf16.mxu0 %v1627_v0 }
 0x2fe   : > { %1295 = vmatpush3.bf16.msra.mxu0 %v1829_v2 }
 0x2ff   : > { %1296 = vmatprep.subr.bf16.mxu0 %v1627_v0 }
 0x302   : > { %1297 = vmatpush3.bf16.msra.mxu0 %v1835_v3 }
 0x303   : > { %1298 = vmatprep.subr.bf16.mxu0 %v1627_v0 }
 0x306   : > { %1299 = vmatpush3.bf16.msra.mxu0 %v1839_v4 }
 0x307   : > { %1300 = vmatprep.subr.bf16.mxu0 %v1627_v0 }
 0x30a   : > { %1301 = vmatpush3.bf16.msra.mxu0 %v1845_v5 }
 0x30b   : > { %1302 = vmatprep.subr.bf16.mxu0 %v1627_v0 }
 0x30e   : > { %1303 = vmatpush3.bf16.msra.mxu0 %v1853_v7 }
 0x30f   : > { %1304 = vmatprep.subr.bf16.mxu0 %v1627_v0 }
 0x312   : > { %1305 = vmatpush3.bf16.msra.mxu0 %v1863_v10  ;;  %v1431_v10 = vld [vmem:[#allocation8 + $0x28] sm:$0xff]  }
 0x313   : > { %1306 = vmatprep.subr.bf16.mxu0 %v1627_v0  ;;  %1317 = vmatpush3.bf16.msra.mxu1 %v1431_v10 }
 0x314   : > { %1318 = vmatprep.subr.bf16.mxu1 %v1627_v0 }
 0x316   : > { %1307 = vmatpush3.bf16.msra.mxu0 %v1870_v12  ;;  %v1433_v12 = vld [vmem:[#allocation8 + $0x18] sm:$0xff]  }
 0x317   : > { %1319 = vmatpush3.bf16.msra.mxu1 %v1432_v11 }
 0x318   : > { %1320 = vmatprep.subr.bf16.mxu1 %v1627_v0 }
 0x31b   : > { %1321 = vmatpush3.bf16.msra.mxu1 %v1433_v12 }
 0x31c   : > { %1322 = vmatprep.subr.bf16.mxu1 %v1627_v0 }
 0x31f   : > { %1323 = vmatpush3.bf16.msra.mxu1 %v1434_v13 }
 0x320   : > { %1324 = vmatprep.subr.bf16.mxu1 %v1627_v0 }
 0x323   : > { %1325 = vmatpush3.bf16.msra.mxu1 %v1435_v14 }
 0x324   : > { %1326 = vmatprep.subr.bf16.mxu1 %v1627_v0  ;;  %v1087_v0 = vld [vmem:[%s2038_s7] ss:$0 sm:$0xff] }
 0x327   : > { %1327 = vmatpush3.bf16.msra.mxu1 %v1436_v15 }
 0x3b3   : > { %v765_v58 = vpop.f32.mrf.mxu1 }
 0x3b5   : > { %v1290_v59 = vpop.f32.mrf.mxu1 }
 0x3b7   : > { %v768_v60 = vpop.f32.mrf.mxu1 }
 0x3b9   : > { %v725_v61 = vpop.f32.mrf.mxu0  ;;  %v1291_v62 = vpop.f32.mrf.mxu1 }
 0x3ba   : > { %v766_v63 = vadd.f32 %v765_v58, %v725_v61 }
 0x3bb   : > { %v1270_v1 = vpop.f32.mrf.mxu0 }
 0x3bc   : > { %v771_v2 = vmul.f32 0.0078125, %v766_v63 }
 0x3bd   : > { %v728_v3 = vpop.f32.mrf.mxu0 }
 0x3be   : > { %v772_v4 = vsub.f32 %v679_v49, %v771_v2 }
 0x3bf   : > { %v1271_v5 = vpop.f32.mrf.mxu0 }
 0x3c0   : > { %v773_v7 = vmul.f32 %v772_v4, %v772_v4 }
 0x3c2   : > { %v774_v8 = vpack.c.bf16 %v773_v7, %v773_v7 }
 0x3c4   : > { %1309 = vmatmul.mubr.bf16.vlgmr.msra.gmra.mxu0 %v774_v8 }
 0x484   : > { %v809_v16 = vpop.f32.mrf.mxu0 }
 0x485   : > { %v815_v17 = vmul.f32 0.0078125, %v809_v16 }
 0x486   : > { %v1310_v18 = vpop.f32.mrf.mxu0 }
 0x487   : > { %v816_v19 = vadd.f32 1e-05, %v815_v17 }
 0x488   : > { %v812_v20 = vpop.f32.mrf.mxu0 }
 0x489   : > { %1439 = vrsqrt.f32 %v816_v19 }
 0x48a   : > { %v1311_v21 = vpop.f32.mrf.mxu0 }
 0x496   : > { %v1440_v22 = vpop.eup %1439 }
 0x497   : > { %v818_v24 = vmul.f32 %v1440_v22, %v772_v4 }
 0x499   : > { %v825_v25 = vmul.f32 %v1086_v23, %v818_v24 }
 0x49b   : > { %v832_v26 = vadd.f32 %v1087_v0, %v825_v25 }
 0x49d   : > { %v833_v27 = vmax.f32 %v832_v26, 0.0 }
 0x49f   : > { %v834_v28 = vpack.c.bf16 %v833_v27, %v833_v27 }
 0x4a1   : > { %1329 = vmatmul.mubr.bf16.vlgmr.msra.gmra.mxu1 %v834_v28 }
 0x561   : > { %v933_v29 = vpop.f32.mrf.mxu1 }
 0x562   : > { %v934_v30 = vadd.f32 %v933_v29, %v1847_v6 }
 0x563   : > { %v1330_v31 = vpop.f32.mrf.mxu1 }
 0x564   : > { %v939_v32 = vmax.f32 %v934_v30, 0.0 }
 0x565   : > { %v936_v33 = vpop.f32.mrf.mxu1 }
 0x566   : > { %940 = vst [vmem:[%s364_s20] sm:$0xff] %v939_v32 }
 0x567   : > { %v1331_v34 = vpop.f32.mrf.mxu1 }
 0x568   : > { %1560 = shalt.err (!%p1557_p9)
}
 0x569   : > { %s1561_s17 = scalar_lea.hbm %s1988_s5, 128  ;;  %s1565_s21 = scalar_lea.hbm %s2039_s8, 256 }
 0x56a   : > { %p1562_p13 = scmp.ne.s32.totalorder %s1988_s5, %s1561_s17  ;;  %p1566_p11 = scmp.lt.s32.totalorder %s1988_s5, %s2039_s8 }
 0x56b   : > { %p1567_p1 = scmp.lt.s32.totalorder %s1565_s21, %s1561_s17 }
 0x56c   : > { %p1563_p10 = pnand %p1562_p13, %p2063_p6 }
 0x56d   : > { %p1568_p2 = por %p1567_p1, %p1566_p11 }
 0x56e   : > { %p1564_p8 = pneg %p1563_p10 }
 0x570   : > { %p1569_p4 = pnand %p1568_p2, %p1564_p8 }
 0x572   : > { %1572 = shalt.err (!%p1569_p4)
}
 0x573   : > { %1346 = dma.vmem_to_hbm [thread:$0]  (%p2063_p6), %s1990_s15, 128, %s1988_s5, %s942_s9  }
 0x574 PF: > { %s967_s23 = sand.u32 1, %s1607_s27   ;;  %p2064_p12 = scmp.ne.s32.totalorder %s2048_s12, 0 }
 0x575   : > { %p2065_p0 = scmp.ge.s32.totalorder %s1619_s30, 2  ;;  %s968_s20 = scalar_lea.sflag [#allocation4], %s967_s23 }
 0x577   : > { %p1363_p5 = pnand %p2065_p0, %p2064_p12 }
 0x579   : > { %p1364_p3 = pneg %p1363_p5 }
 0x57b   : > { %1602 = dma.done.wait (%p1364_p3), %s968_s20, 128  }
 0x57c   : > { %1604 = vsyncadd (%p1364_p3), %s968_s20, 4294967168  ;;  %p23_p7 = scmp.ge.s32.totalorder %s1755_s18, 4   ;;  %s2066_s27 = smov %s1611_s28 }
 0x57d   : > { %s2067_s28 = smov %s1615_s29  ;;  %s2068_s29 = smov %s1765_s24 }
 0x57e   : > { %s2069_s30 = smov %s1755_s18  ;;  %25 = sbr.rel (!%p23_p7) target bundleno = 11 (0xb), region = 109 }
 0x583   :  { %973 = vsyncpa [#allocation3], 1 }
 0x584   :  { %975 = vsyncpa [#allocation3 + $0x1], 1 }
 0x585   :  { %976 = vsyncpa [#allocation6], 1 }
 0x586   :  { %977 = vsyncpa [#allocation9], 1 }
 0x587   :  { %978 = vsyncpa [#allocation4], 1 }
 0x588   :  { %980 = vsyncpa [#allocation4 + $0x1], 1 }

</bundles_post_ra>
